<compile_context>
chip_gen: v5e
topology: v5e:2x2
jax: 0.10.0
libtpu: 0.0.40
codegen_flags: <defaults>
</compile_context>

<pallas_src>
import functools

import jax
import jax.numpy as jnp
from jax.experimental import pallas as pl
from jax.experimental.pallas import tpu as pltpu


def _i32(v):
    """Python uint32 constant -> equivalent signed int32 (two's complement)."""
    v &= 0xFFFFFFFF
    return v - 0x100000000 if v >= 0x80000000 else v


_SM32_GOLDEN = _i32(0x9E3779B9)
_SM32_MUL1 = _i32(0x7FEB352D)
_SM32_MUL2 = _i32(0x846CA68B)
_SIGN_BIT = _i32(0x80000000)


def _apply_activation(y, name):
    """Activations from CompleteLayer.interpret_activation (f32 elementwise)."""
    if name is None:
        return y
    if name == "relu":
        return jnp.maximum(y, 0.0)
    if name == "leaky_relu":
        return jnp.where(y >= 0.0, y, 0.01 * y)
    if name == "sigmoid":
        return jax.nn.sigmoid(y)
    if name == "tanh":
        return jnp.tanh(y)
    if name == "selu":
        return 1.0507009873554805 * jnp.where(
            y > 0.0, y, 1.6732632423543772 * jnp.expm1(y))
    if name == "hardtanh":
        return jnp.clip(y, -1.0, 1.0)
    if name == "relu6":
        return jnp.clip(y, 0.0, 6.0)
    if name in ("elu", "celu"):  # alpha=1.0 default -> identical
        return jnp.where(y > 0.0, y, jnp.expm1(y))
    if name == "hardshrink":
        return jnp.where(jnp.abs(y) > 0.5, y, 0.0)
    if name == "tanhshrink":
        return y - jnp.tanh(y)
    if name == "softsign":
        return y / (1.0 + jnp.abs(y))
    # TODO(synk): rrelu (randomized leaky ReLU) needs its own per-element RNG
    # stream; not implemented.
    raise ValueError(f"activation {name} not understood")


def _dropout_keep_mask(shape, seed, row_offset, n_cols, keep_threshold_flipped):
    """Boolean keep-mask from a splitmix32 hash of global element index + seed.

    All arithmetic is wrapping int32 with logical right shifts, so it lowers
    both through Mosaic and the Pallas interpreter. The final keep decision is
    one integer compare per element (unsigned compare via the sign-flip trick).
    """
    r = jax.lax.broadcasted_iota(jnp.int32, shape, 0) + row_offset
    c = jax.lax.broadcasted_iota(jnp.int32, shape, 1)
    h = r * jnp.int32(n_cols) + c
    h = h + seed * jnp.int32(_SM32_GOLDEN)
    h = h ^ jax.lax.shift_right_logical(h, 16)
    h = h * jnp.int32(_SM32_MUL1)
    h = h ^ jax.lax.shift_right_logical(h, 15)
    h = h * jnp.int32(_SM32_MUL2)
    h = h ^ jax.lax.shift_right_logical(h, 16)
    # keep  <=>  uint32(h) >= p * 2**32   (exact to 1/2**32)
    return (h ^ jnp.int32(_SIGN_BIT)) >= jnp.int32(keep_threshold_flipped)


def complete_layer_kernel(seed_ref, x_ref, w_ref, b_ref, o_ref, *,
                          activation, dropout_p, block_rows, out_dim):
    # Linear: y = x @ W^T + b  (MXU matmul, f32 accumulate; inputs may be bf16)
    y = jnp.dot(x_ref[...], w_ref[...], preferred_element_type=jnp.float32)
    y = y + b_ref[...].astype(jnp.float32)

    # Activation (VPU/EUP, f32)
    y = _apply_activation(y, activation)

    # Dropout (training-mode semantics: drop w.p. p, scale kept by 1/(1-p))
    if dropout_p is not None and dropout_p > 0.0:
        thresh = min(max(int(round(dropout_p * 4294967296.0)), 0), 0xFFFFFFFF)
        thresh_flipped = _i32(thresh ^ 0x80000000)
        row_offset = pl.program_id(0) * block_rows  # global row of this tile
        keep = _dropout_keep_mask(y.shape, seed_ref[0], row_offset,
                                  out_dim, thresh_flipped)
        y = jnp.where(keep, y * jnp.float32(1.0 / (1.0 - dropout_p)), 0.0)

    o_ref[...] = y.astype(o_ref.dtype)


def complete_layer(x, w_t, b, seed, *, activation=None, dropout_p=None,
                   block_rows=1024, matmul_dtype=jnp.bfloat16,
                   out_dtype=jnp.float32):
    """CompleteLayer forward: dropout(activation(x @ w_t + b)).

    x:    [batch, in_dim]
    w_t:  [in_dim, out_dim]  (torch Linear weight, pre-transposed)
    b:    [out_dim] or [1, out_dim]
    seed: [1] int32 (dropout PRNG seed; unused if dropout_p is None/0)
    """
    batch, in_dim = x.shape
    out_dim = w_t.shape[1]

    if matmul_dtype is not None:
        x = x.astype(matmul_dtype)
        w_t = w_t.astype(matmul_dtype)
    b2 = jnp.asarray(b, jnp.float32).reshape(1, out_dim)

    # Batch tile: large enough to amortize per-step overhead, small enough to
    # double-buffer comfortably inside v7x's 32 MiB default scoped VMEM.
    tb = min(batch, block_rows)
    grid = (pl.cdiv(batch, tb),)

    kernel = functools.partial(
        complete_layer_kernel,
        activation=activation, dropout_p=dropout_p,
        block_rows=tb, out_dim=out_dim)

    return pl.pallas_call(
        kernel,
        out_shape=jax.ShapeDtypeStruct((batch, out_dim), out_dtype),
        grid_spec=pltpu.PrefetchScalarGridSpec(
            num_scalar_prefetch=1,                     # seed lands in SMEM
            grid=grid,
            in_specs=[
                # x tiles stream along the batch axis (double-buffered DMA).
                pl.BlockSpec((tb, in_dim), lambda i, seed: (i, 0)),
                # W and b stay resident in VMEM across all grid steps.
                pl.BlockSpec((in_dim, out_dim), lambda i, seed: (0, 0)),
                pl.BlockSpec((1, out_dim), lambda i, seed: (0, 0)),
            ],
            out_specs=pl.BlockSpec((tb, out_dim), lambda i, seed: (i, 0)),
        ),
        compiler_params=pltpu.CompilerParams(
            # Batch tiles are independent -> megacore (v7x) can shard them.
            dimension_semantics=("parallel",)),
    )(seed, x, w_t, b2)


if __name__ == "__main__":
    IN_DIM, OUT_DIM, BATCH = 64, 128, 16
    DROPOUT_P = 0.1
    ACTIVATION = "relu"

    key = jax.random.PRNGKey(0)
    kx, kw, kb = jax.random.split(key, 3)

    # Parameter init mimicking torch.nn.Linear defaults:
    # uniform(-1/sqrt(in_dim), 1/sqrt(in_dim)) for weight and bias.
    bound = 1.0 / (IN_DIM ** 0.5)
    w = jax.random.uniform(kw, (OUT_DIM, IN_DIM), jnp.float32, -bound, bound)
    b = jax.random.uniform(kb, (OUT_DIM,), jnp.float32, -bound, bound)
    x = jax.random.normal(kx, (BATCH, IN_DIM), jnp.float32)

    w_t = jnp.transpose(w)                  # [in_dim, out_dim] for x @ W^T
    seed = jnp.array([1234], dtype=jnp.int32)

    out = complete_layer(x, w_t, b, seed, activation=ACTIVATION,
                         dropout_p=DROPOUT_P)
    out = jax.block_until_ready(out)

    # Reference with the same bf16-rounded inputs (kernel accumulates in f32).
    # Wherever dropout kept a value it must equal relu(x @ W^T + b)/(1-p);
    # zeros may be either ReLU'd or dropped.
    x_r = x.astype(jnp.bfloat16).astype(jnp.float32)
    w_r = w_t.astype(jnp.bfloat16).astype(jnp.float32)
    ref = jnp.maximum(x_r @ w_r + b.reshape(1, -1), 0.0) / (1.0 - DROPOUT_P)

    kept = out != 0.0
    max_err = float(jnp.max(jnp.where(kept, jnp.abs(out - ref), 0.0)))
    nonzero_frac = float(jnp.mean(kept.astype(jnp.float32)))

    assert out.shape == (BATCH, OUT_DIM)
    assert max_err < 5e-3, f"max_err={max_err}"
    # ~50% ReLU zeros * 90% dropout keep -> expect roughly 0.45 nonzero.
    assert 0.25 < nonzero_frac < 0.65, f"nonzero_frac={nonzero_frac}"

    print("KERNEL_OK")
</pallas_src>

<mosaic_0001>
module attributes {stable_mosaic.version = 11 : i64} {
  func.func @complete_layer_kernel(%arg0: i32, %arg1: memref<1xi32, #tpu.memory_space<smem>>, %arg2: memref<16x64xbf16, #tpu.memory_space<vmem>>, %arg3: memref<64x128xbf16, #tpu.memory_space<vmem>>, %arg4: memref<1x128xf32, #tpu.memory_space<vmem>>, %arg5: memref<16x128xf32, #tpu.memory_space<vmem>>) attributes {dimension_semantics = [#tpu.dimension_semantics<parallel>], iteration_bounds = array<i64: 1>, scalar_prefetch = 1 : i64, scratch_operands = 0 : i64, tpu.core_type = #tpu.core_type<tc>, window_params = [{transform_indices = @transform_0, window_bounds = array<i64: 16, 64>}, {pipeline_mode = #tpu.pipeline_mode<synchronous>, transform_indices = @transform_1, window_bounds = array<i64: 64, 128>}, {pipeline_mode = #tpu.pipeline_mode<synchronous>, transform_indices = @transform_2, window_bounds = array<i64: 1, 128>}, {transform_indices = @transform_3, window_bounds = array<i64: 16, 128>}]} {
    %c0 = arith.constant 0 : index
    %c0_0 = arith.constant 0 : index
    %0 = vector.load %arg2[%c0, %c0_0] : memref<16x64xbf16, #tpu.memory_space<vmem>>, vector<16x64xbf16>
    %c0_1 = arith.constant 0 : index
    %c0_2 = arith.constant 0 : index
    %1 = vector.load %arg3[%c0_1, %c0_2] : memref<64x128xbf16, #tpu.memory_space<vmem>>, vector<64x128xbf16>
    %cst = arith.constant dense<0.000000e+00> : vector<16x128xf32>
    %2 = tpu.matmul %0, %1, %cst {dimension_numbers = #tpu.dot_dimension_numbers<[1], [0], [0], [1], [0, 0, 1, 1], [], []>} : vector<16x64xbf16>, vector<64x128xbf16>, vector<16x128xf32> -> vector<16x128xf32>
    %c0_3 = arith.constant 0 : index
    %c0_4 = arith.constant 0 : index
    %3 = vector.load %arg4[%c0_3, %c0_4] : memref<1x128xf32, #tpu.memory_space<vmem>>, vector<1x128xf32>
    %4 = vector.broadcast %3 : vector<1x128xf32> to vector<16x128xf32>
    %5 = arith.addf %2, %4 : vector<16x128xf32>
    %cst_5 = arith.constant 0.000000e+00 : f32
    %6 = vector.broadcast %cst_5 : f32 to vector<16x128xf32>
    %7 = arith.maximumf %5, %6 : vector<16x128xf32>
    %c16_i32 = arith.constant 16 : i32
    %8 = arith.muli %arg0, %c16_i32 : i32
    %c0_6 = arith.constant 0 : index
    %9 = memref.load %arg1[%c0_6] : memref<1xi32, #tpu.memory_space<smem>>
    %10 = tpu.iota {dimensions = array<i32: 0>} : vector<16x128xi32>
    %11 = vector.broadcast %8 : i32 to vector<16x128xi32>
    %12 = arith.addi %10, %11 : vector<16x128xi32>
    %13 = tpu.iota {dimensions = array<i32: 1>} : vector<16x128xi32>
    %c128_i32 = arith.constant 128 : i32
    %14 = vector.broadcast %c128_i32 : i32 to vector<16x128xi32>
    %15 = arith.muli %12, %14 : vector<16x128xi32>
    %16 = arith.addi %15, %13 : vector<16x128xi32>
    %c-1640531527_i32 = arith.constant -1640531527 : i32
    %17 = arith.muli %9, %c-1640531527_i32 : i32
    %18 = vector.broadcast %17 : i32 to vector<16x128xi32>
    %19 = arith.addi %16, %18 : vector<16x128xi32>
    %c16_i32_7 = arith.constant 16 : i32
    %20 = vector.broadcast %c16_i32_7 : i32 to vector<16x128xi32>
    %21 = arith.shrui %19, %20 : vector<16x128xi32>
    %22 = arith.xori %19, %21 : vector<16x128xi32>
    %c2146121005_i32 = arith.constant 2146121005 : i32
    %23 = vector.broadcast %c2146121005_i32 : i32 to vector<16x128xi32>
    %24 = arith.muli %22, %23 : vector<16x128xi32>
    %c15_i32 = arith.constant 15 : i32
    %25 = vector.broadcast %c15_i32 : i32 to vector<16x128xi32>
    %26 = arith.shrui %24, %25 : vector<16x128xi32>
    %27 = arith.xori %24, %26 : vector<16x128xi32>
    %c-2073254261_i32 = arith.constant -2073254261 : i32
    %28 = vector.broadcast %c-2073254261_i32 : i32 to vector<16x128xi32>
    %29 = arith.muli %27, %28 : vector<16x128xi32>
    %c16_i32_8 = arith.constant 16 : i32
    %30 = vector.broadcast %c16_i32_8 : i32 to vector<16x128xi32>
    %31 = arith.shrui %29, %30 : vector<16x128xi32>
    %32 = arith.xori %29, %31 : vector<16x128xi32>
    %c-2147483648_i32 = arith.constant -2147483648 : i32
    %33 = vector.broadcast %c-2147483648_i32 : i32 to vector<16x128xi32>
    %34 = arith.xori %32, %33 : vector<16x128xi32>
    %c-1717986918_i32 = arith.constant -1717986918 : i32
    %35 = vector.broadcast %c-1717986918_i32 : i32 to vector<16x128xi32>
    %36 = arith.cmpi sge, %34, %35 : vector<16x128xi32>
    %cst_9 = arith.constant 1.11111116 : f32
    %37 = vector.broadcast %cst_9 : f32 to vector<16x128xf32>
    %38 = arith.mulf %7, %37 : vector<16x128xf32>
    %cst_10 = arith.constant 0.000000e+00 : f32
    %39 = vector.broadcast %cst_10 : f32 to vector<16x128xf32>
    %40 = arith.select %36, %38, %39 : vector<16x128xi1>, vector<16x128xf32>
    %c0_11 = arith.constant 0 : index
    %c0_12 = arith.constant 0 : index
    %41 = vector.load %arg5[%c0_11, %c0_12] : memref<16x128xf32, #tpu.memory_space<vmem>>, vector<16x128xf32>
    tpu.vector_store %arg5[%c0_11, %c0_12], %40 {strides = array<i32>} : memref<16x128xf32, #tpu.memory_space<vmem>>, vector<16x128xf32>,
    return
  }
  func.func @transform_0(%arg0: i32, %arg1: memref<1xi32, #tpu.memory_space<smem>>) -> (i32, i32) {
    %c0_i32 = arith.constant 0 : i32
    %c0_i32_0 = arith.constant 0 : i32
    return %arg0, %c0_i32 : i32, i32
  }
  func.func @transform_1(%arg0: i32, %arg1: memref<1xi32, #tpu.memory_space<smem>>) -> (i32, i32) {
    %c0_i32 = arith.constant 0 : i32
    %c0_i32_0 = arith.constant 0 : i32
    %c0_i32_1 = arith.constant 0 : i32
    return %c0_i32, %c0_i32_0 : i32, i32
  }
  func.func @transform_2(%arg0: i32, %arg1: memref<1xi32, #tpu.memory_space<smem>>) -> (i32, i32) {
    %c0_i32 = arith.constant 0 : i32
    %c0_i32_0 = arith.constant 0 : i32
    %c0_i32_1 = arith.constant 0 : i32
    return %c0_i32, %c0_i32_0 : i32, i32
  }
  func.func @transform_3(%arg0: i32, %arg1: memref<1xi32, #tpu.memory_space<smem>>) -> (i32, i32) {
    %c0_i32 = arith.constant 0 : i32
    %c0_i32_0 = arith.constant 0 : i32
    return %arg0, %c0_i32 : i32, i32
  }
}

</mosaic_0001>

<bundles_post_ra>
// kernel: tpu_custom_call.1
= control target key start
LH: loop header
LB: loop body
LE: loop exit
PB: predicated region body
PF: predicated region fallthrough
CT: control target
= control target key end

     0   :  { %10 = vsyncpa [#allocation5], 0  ;;  %s336_s0 = inlined_call_operand.<no memory space> [shape: s32[1], index: 0, kind: input, shape index: {}]   ;;  %s337_s1 = inlined_call_operand.hbm [shape: bf16[16,64], index: 1, kind: input, shape index: {}]   ;;  %s338_s2 = inlined_call_operand.hbm [shape: bf16[64,128], index: 2, kind: input, shape index: {}]   ;;  %s339_s3 = inlined_call_operand.vmem [shape: f32[1,128], index: 3, kind: input, shape index: {}]   ;;  %s340_s4 = inlined_call_operand.hbm [shape: f32[16,128], index: 4, kind: output, shape index: {}]  }
   0x1   :  { %11 = vsyncpa [#allocation8], 0 }
   0x2   :  { %12 = vsyncpa [#allocation6], 0  ;;  %s17_s17 = sshll.u32 %s337_s1, 4  ;;  %s289_s18 = smov [#allocation4]   ;;  %s18_s17 = int_to_ptr.hbm [resolvable:$true] %s17_s17 }
   0x3   :  { %s19_s19 = sshll.u32 %s289_s18, 4  ;;  %s30_s22 = sshll.u32 %s338_s2, 4  ;;  %s20_s19 = int_to_ptr.vmem [resolvable:$true] %s19_s19  ;;  %s31_s22 = int_to_ptr.hbm [resolvable:$true] %s30_s22 }
   0x4   :  { %s290_s23 = smov 64   ;;  %s291_s24 = smov 4  }
   0x5   :  { %25 = dma.hbm_to_vmem [thread:$0]  %s18_s17, 128, %s20_s19, [#allocation5], %s290_s23, %s290_s23, %s291_s24  }
   0x6   :  { %s292_s25 = smov [#allocation7]  }
   0x7   :  { %s32_s26 = sshll.u32 %s292_s25, 4  ;;  %s33_s26 = int_to_ptr.vmem [resolvable:$true] %s32_s26 }
   0x8   :  { %38 = dma.hbm_to_vmem [thread:$0]  %s31_s22, 512, %s33_s26, [#allocation8], %s290_s23, %s290_s23, %s291_s24  }
   0x9   :  { %283 = dma.done.wait [#allocation5], 128  }
   0xa   :  { %284 = vsyncadd [#allocation5], 4294967168 }
   0xb   :  { %285 = dma.done.wait [#allocation8], 512  }
   0xc   :  { %286 = vsyncadd [#allocation8], 4294966784  ;;  %v202_v0 = vld [vmem:[#allocation7 + $0x18] sm:$0xff]  ;;  %v201_v1 = vld [vmem:[#allocation7 + $0x10] sm:$0xff]  ;;  %vm93_vm0 = vcmask 523264   ;;  %v115_v5 = vlaneseq  ;;  %s293_s29 = smov [#allocation9]  }
   0xd   :  { %101 = vmatpush.bf16.msra.mxu0 %v202_v0  ;;  %v200_v2 = vld [vmem:[#allocation7 + $0x8] sm:$0xff]  ;;  %v199_v3 = vld [vmem:[#allocation7] sm:$0xff]  ;;  %v198_v4 = vld [vmem:[#allocation4] sm:$0xff]  ;;  %s127_s27 = smul.u32 2654435769, %s336_s0  ;;  %s161_s30 = sshll.u32 %s293_s29, 4  ;;  %s162_s30 = int_to_ptr.vmem [resolvable:$true] %s161_s30 }
   0xe   :  { %v116_v6 = vshrl.u32 %v115_v5, 7  ;;  %v122_v7 = vand.u32 127, %v115_v5  ;;  %v210_v30 = vld [vmem:[%s339_s3] ss:$0 sm:$0xff]  ;;  %s163_s7 = sshll.u32 %s340_s4, 4  ;;  %s294_s3 = smov 128   ;;  %s164_s7 = int_to_ptr.hbm [resolvable:$true] %s163_s7 }
   0xf   :  { %v128_v11 = vstv %s127_s27  ;;  %s295_s8 = smov 8  }
  0x10   :  { %v123_v8 = vmul.u32 128, %v116_v6  ;;  %v117_v10 = vadd.s32 8, %v116_v6 }
  0x11   :  { %102 = vmatpush.bf16.msra.mxu0 %v201_v1 }
  0x12   :  { %v125_v9 = vadd.s32 %v123_v8, %v122_v7  ;;  %v124_v13 = vmul.u32 128, %v117_v10 }
  0x14   :  { %v129_v12 = vadd.s32 %v128_v11, %v125_v9  ;;  %v126_v15 = vadd.s32 %v124_v13, %v122_v7 }
  0x15   :  { %103 = vmatpush.bf16.msra.mxu0 %v200_v2 }
  0x16   :  { %v131_v14 = vshrl.u32 %v129_v12, 16  ;;  %v130_v17 = vadd.s32 %v128_v11, %v126_v15 }
  0x18   :  { %v133_v16 = vxor.u32 %v131_v14, %v129_v12  ;;  %v132_v19 = vshrl.u32 %v130_v17, 16 }
  0x19   :  { %104 = vmatpush.bf16.msra.mxu0 %v199_v3 }
  0x1a   :  { %v135_v18 = vmul.u32 2146121005, %v133_v16  ;;  %v134_v21 = vxor.u32 %v132_v19, %v130_v17 }
  0x1c   :  { %197 = vmatmul.msk.bf16.vlgmr.msra.gmra.mxu0 %vm93_vm0, %v198_v4  ;;  %v137_v20 = vshrl.u32 %v135_v18, 15  ;;  %v136_v23 = vmul.u32 2146121005, %v134_v21 }
  0x1e   :  { %v139_v22 = vxor.u32 %v137_v20, %v135_v18  ;;  %v138_v25 = vshrl.u32 %v136_v23, 15 }
  0x20   :  { %v141_v24 = vmul.u32 2221713035, %v139_v22  ;;  %v140_v27 = vxor.u32 %v138_v25, %v136_v23 }
  0x22   :  { %v143_v26 = vshrl.u32 %v141_v24, 16  ;;  %v142_v29 = vmul.u32 2221713035, %v140_v27 }
  0x24   :  { %v145_v28 = vxor.u32 %v143_v26, %v141_v24  ;;  %v144_v33 = vshrl.u32 %v142_v29, 16 }
  0x26   :  { %v147_v32 = vxor.u32 2147483648, %v145_v28  ;;  %v146_v36 = vxor.u32 %v144_v33, %v142_v29 }
  0x28   :  { %vm149_vm1 = vcmp.ge.s32.totalorder %v147_v32, 2576980378  ;;  %v148_v40 = vxor.u32 2147483648, %v146_v36 }
  0x2a   :  { %vm150_vm2 = vcmp.ge.s32.totalorder %v148_v40, 2576980378 }
  0x99   :  { %v106_v31 = vpop.f32.mrf.mxu0 }
  0x9a   :  { %v107_v34 = vadd.f32 %v210_v30, %v106_v31 }
  0x9c   :  { %v111_v35 = vmax.f32 %v107_v34, 0.0 }
  0x9e   :  { %v151_v37 = vmul.f32 1.1111112, %v111_v35 }
  0xa0   :  { %v153_v38 = vsel %vm149_vm1, %v151_v37, 0.0 }
  0xa1   :  { %155 = vst [vmem:[#allocation9] sm:$0xff] %v153_v38  ;;  %v108_v39 = vpop.f32.mrf.mxu0 }
  0xa2   :  { %v109_v41 = vadd.f32 %v210_v30, %v108_v39 }
  0xa4   :  { %v112_v42 = vmax.f32 %v109_v41, 0.0 }
  0xa6   :  { %v152_v43 = vmul.f32 1.1111112, %v112_v42 }
  0xa8   :  { %v154_v44 = vsel %vm150_vm2, %v152_v43, 0.0 }
  0xa9   :  { %156 = vst [vmem:[#allocation9 + $0x8] sm:$0xff] %v154_v44 }
  0xaa   :  { %169 = dma.vmem_to_hbm [thread:$0]  %s162_s30, 256, %s164_s7, [#allocation6], %s294_s3, %s294_s3, %s295_s8  }
  0xab   :  { %287 = dma.done.wait [#allocation6], 256  }
  0xac   :  { %288 = vsyncadd [#allocation6], 4294967040 }
  0xad   :  { %174 = vsyncpa [#allocation5], 1 }
  0xae   :  { %175 = vsyncpa [#allocation8], 1 }
  0xaf   :  { %176 = vsyncpa [#allocation6], 1 }

</bundles_post_ra>
